<compile_context>
chip_gen: v6e
topology: v6e:2x2x1
jax: 0.10.0
libtpu: 0.0.40
codegen_flags: <defaults>
</compile_context>

<pallas_src>
import functools

import numpy as np
import jax
import jax.numpy as jnp
from jax.experimental import pallas as pl
from jax.experimental.pallas import tpu as pltpu

# ----- module-level "globals" of the original script (chosen small) -----
N_FINGERPRINT = 50
DIM = 32
HIDDEN_LAYER = 2
OUTPUT_LAYER = 2
UPDATE = "sum"    # torch: 'sum' -> xs + A @ hs ; 'mean' -> xs + (A @ hs)/(M-1)
OUTPUT = "mean"   # torch: per-graph sum_axis / mean_axis pooling

# TPU tile granularity.
LANE = 128
SUBLANE = 8
NODE_TILE = 32    # node-axis padding granularity (covers bf16 sublane packing)


def _round_up(x, m):
    return ((x + m - 1) // m) * m


def _pad_last2(x, rows, cols):
    """Zero-pad the last two dims of x up to (rows, cols)."""
    pad = [(0, 0)] * (x.ndim - 2) + [(0, rows - x.shape[-2]), (0, cols - x.shape[-1])]
    return jnp.pad(x, pad)


def _has_bf16_vpu():
    """bf16 VALU exists on v6e / v7x; v5-class and older do f32 VPU only."""
    try:
        kind = jax.devices()[0].device_kind.lower()
    except Exception:
        return False
    return any(tag in kind for tag in ("v6", "v7", "7x"))


# ----------------------------- Pallas kernel -----------------------------
def gnn_kernel(x_ref, a_ref, pool_ref, w_ref, b_ref, wprop_ref, bprop_ref, o_ref,
               *, bf16_act):
    """Whole padded GNN forward, single grid point.

    x_ref    : (N_PAD, DIM_PAD) f32   embedded fingerprint vectors (zero-padded)
    a_ref    : (N_PAD, N_PAD)   bf16  block-diag adjacency (row-scaled if UPDATE=='mean')
    pool_ref : (G_PAD, N_PAD)   bf16  per-graph pooling weights (sum or mean)
    w_ref    : (HIDDEN_LAYER+OUTPUT_LAYER, DIM_PAD, DIM_PAD) bf16  packed Linear weights
    b_ref    : (HIDDEN_LAYER+OUTPUT_LAYER, 1, DIM_PAD)       f32   packed Linear biases
    wprop_ref: (1, DIM_PAD)     bf16  property head weight (row layout)
    bprop_ref: (1,)             f32   property head bias (SMEM scalar)
    o_ref    : (G_PAD, LANE)    f32   prediction broadcast across lanes (lane-dense store)
    """
    f32 = jnp.float32
    bf16 = jnp.bfloat16

    xs = x_ref[...]                               # (N_PAD, DIM_PAD), f32 residual stream
    a_bf = a_ref[...]                             # bf16, straight into the MXU

    # "GNN updates the fingerprint vectors."
    for i in range(HIDDEN_LAYER):
        w = w_ref[i]                              # (DIM_PAD, DIM_PAD), bf16
        b = b_ref[i]                              # (1, DIM_PAD), f32
        pre = jnp.dot(xs.astype(bf16), w, preferred_element_type=f32)
        if bf16_act:
            # v6e/v7x: bias-add + relu in bf16, hs feeds the A@hs dot directly.
            hs = jnp.maximum(pre.astype(bf16) + b.astype(bf16), 0)
            msg = jnp.dot(a_bf, hs, preferred_element_type=f32)
        else:
            # v5-class: no bf16 VALU -> keep the elementwise path in f32.
            hs = jnp.maximum(pre + b, 0.0)
            msg = jnp.dot(a_bf, hs.astype(bf16), preferred_element_type=f32)
        # UPDATE=='mean' normalization is pre-folded into A by the wrapper.
        xs = xs + msg                             # residual update in f32

    # Per-graph pooling (sum_axis / mean_axis) as one matmul with a precomputed
    # segment-pool matrix.
    mv = jnp.dot(pool_ref[...], xs.astype(bf16),
                 preferred_element_type=f32)      # (G_PAD, DIM_PAD), f32

    # Output MLP (tiny: G_PAD rows; keep elementwise in f32 everywhere).
    for j in range(OUTPUT_LAYER):
        w = w_ref[HIDDEN_LAYER + j]
        b = b_ref[HIDDEN_LAYER + j]
        mv = jnp.maximum(jnp.dot(mv.astype(bf16), w, preferred_element_type=f32) + b, 0.0)

    # Property head: VPU broadcast-multiply (f32 accumulate; bf16 weight row is
    # promoted) + lane (XLU) reduce, then broadcast back across lanes so the
    # final store is an unmasked full-tile vst.
    pred = jnp.sum(mv * wprop_ref[...], axis=-1, keepdims=True) + bprop_ref[0]
    o_ref[...] = jnp.broadcast_to(pred, o_ref.shape)


# ------------------------------- wrapper -----------------------------------
def build_gnn_forward(Wfp, bfp, Wout, bout, Wprop, bprop):
    """One-time constant prep + a jitted per-batch forward.

    Returns forward(x, A, M, pool) -> (G, 1) predictions.
    """
    d_pad = _round_up(DIM, LANE)

    # Pack hidden + output Linear layers into single (L, D, D) / (L, 1, D) arrays.
    # MXU operands are stored bf16 (halves their DMA bytes); biases stay f32.
    w_all = _pad_last2(jnp.concatenate([Wfp, Wout], axis=0), d_pad, d_pad).astype(jnp.bfloat16)
    b_all = _pad_last2(jnp.concatenate([bfp, bout], axis=0), 1, d_pad)            # f32
    wprop_row = _pad_last2(Wprop.T, 1, d_pad).astype(jnp.bfloat16)                # (1, d_pad)
    bprop_s = bprop.reshape((1,)).astype(jnp.float32)                             # SMEM scalar

    kernel = functools.partial(gnn_kernel, bf16_act=_has_bf16_vpu())

    vmem = pl.BlockSpec(memory_space=pltpu.MemorySpace.VMEM)
    smem = pl.BlockSpec(memory_space=pltpu.MemorySpace.SMEM)

    @jax.jit
    def forward(x, A, M, pool):
        N, _ = x.shape
        G = pool.shape[0]
        n_pad = _round_up(N, NODE_TILE)   # node axis: lanes of A / pool, sublanes of xs
        g_pad = _round_up(G, SUBLANE)

        # Fold UPDATE=='mean' normalization into the adjacency as a row scaling
        # (done in f32 before the bf16 cast): (A @ hs)/(M-1) == (A/(M-1)) @ hs.
        # Guard single-atom graphs.  If tighter-than-bf16 accuracy is ever
        # needed for the 'mean' path, keep A in f32 instead.
        A_eff = A if UPDATE == "sum" else A / jnp.maximum(M - 1.0, 1.0)

        x_p = _pad_last2(x, n_pad, d_pad)                                 # f32
        a_p = _pad_last2(A_eff, n_pad, n_pad).astype(jnp.bfloat16)        # bf16
        pool_p = _pad_last2(pool, g_pad, n_pad).astype(jnp.bfloat16)      # bf16

        # NOTE: at this toy size all operands are whole-array VMEM resident
        # (~0.1 MiB total) and a single grid point is used.  For large N the
        # dense (N, N) adjacency must be grid-tiled (row-block x k-block,
        # reduction axis last / 'arbitrary', f32 msg accumulator scratch) or
        # replaced by a per-graph block-diagonal scheme driven by
        # PrefetchScalarGridSpec with per-graph node offsets.  In that variant:
        #   - give the packed weight stack a constant index_map
        #     (lambda *_: (0, 0, 0)) so it stays VMEM-resident across steps,
        #   - add a leading "parallel" grid axis (dimension_semantics) over
        #     graph groups / row blocks so v7x can shard across its 2 TCs,
        #   - budget tiles for v7x's 64 MiB VMEM (<= ~512-1024 per side f32
        #     double-buffered), not the 128 MiB of v5e/v6e, and set
        #     vmem_limit_bytes explicitly there (not needed here).
        out_slab = pl.pallas_call(
            kernel,
            out_shape=jax.ShapeDtypeStruct((g_pad, LANE), jnp.float32),
            in_specs=[vmem, vmem, vmem, vmem, vmem, vmem, smem],
            out_specs=vmem,
        )(x_p, a_p, pool_p, w_all, b_all, wprop_row, bprop_s)

        return out_slab[:G, 0:1]

    return forward


# ------------------------- pure-JAX reference -----------------------------
def gnn_reference(x, A, M, pool, Wfp, bfp, Wout, bout, Wprop, bprop):
    xs = x
    for i in range(HIDDEN_LAYER):
        hs = jax.nn.relu(xs @ Wfp[i] + bfp[i])
        msg = A @ hs
        if UPDATE == "mean":
            msg = msg / jnp.maximum(M - 1.0, 1.0)
        xs = xs + msg
    mv = pool @ xs
    for j in range(OUTPUT_LAYER):
        mv = jax.nn.relu(mv @ Wout[j] + bout[j])
    return mv @ Wprop + bprop


# ------------------------------- main -------------------------------------
if __name__ == "__main__":
    key = jax.random.PRNGKey(0)
    k_emb, k_fp, k_adj, k_wfp, k_bfp, k_wout, k_bout, k_wp, k_bp = jax.random.split(key, 9)

    # Batch of 3 molecules with 5, 7, 4 atoms -> 16 total nodes.
    sizes = [5, 7, 4]
    N = sum(sizes)
    G = len(sizes)

    # Fingerprint indices per molecule (torch.cat(fingerprints)).
    fingerprints = jax.random.randint(k_fp, (N,), 0, N_FINGERPRINT)

    # Per-node molecule size M (used only when UPDATE == 'mean').
    M_np = np.concatenate([np.repeat(s, s) for s in sizes]).astype(np.float32)
    M = jnp.asarray(M_np)[:, None]                                  # (N, 1)

    # Block-diagonal padded adjacency (pad_value = 0), symmetric, zero diagonal.
    rng = np.random.RandomState(0)
    A_np = np.zeros((N, N), dtype=np.float32)
    off = 0
    for s in sizes:
        a = (rng.rand(s, s) > 0.5).astype(np.float32)
        a = np.triu(a, 1)
        a = a + a.T
        A_np[off:off + s, off:off + s] = a
        off += s
    A = jnp.asarray(A_np)

    # Pooling matrix: row g selects nodes of graph g (1 for sum, 1/size for mean).
    pool_np = np.zeros((G, N), dtype=np.float32)
    off = 0
    for g, s in enumerate(sizes):
        pool_np[g, off:off + s] = 1.0 if OUTPUT == "sum" else 1.0 / s
        off += s
    pool = jnp.asarray(pool_np)

    # ---------------- deterministic parameter init (synthetic) -------------
    # Embedding ~ N(0, 1) (PyTorch nn.Embedding default).
    emb_table = jax.random.normal(k_emb, (N_FINGERPRINT, DIM), dtype=jnp.float32)
    # Linear layers ~ U(-1/sqrt(fan_in), 1/sqrt(fan_in)); stored as (in, out)
    # so the kernel computes x @ W + b (equivalent to torch's x @ W.T + b).
    bound = 1.0 / np.sqrt(DIM)
    Wfp = jax.random.uniform(k_wfp, (HIDDEN_LAYER, DIM, DIM), jnp.float32, -bound, bound)
    bfp = jax.random.uniform(k_bfp, (HIDDEN_LAYER, 1, DIM), jnp.float32, -bound, bound)
    Wout = jax.random.uniform(k_wout, (OUTPUT_LAYER, DIM, DIM), jnp.float32, -bound, bound)
    bout = jax.random.uniform(k_bout, (OUTPUT_LAYER, 1, DIM), jnp.float32, -bound, bound)
    Wprop = jax.random.uniform(k_wp, (DIM, 1), jnp.float32, -bound, bound)
    bprop = jax.random.uniform(k_bp, (1, 1), jnp.float32, -bound, bound)

    # Embedding lookup (glue, plain JAX gather outside the kernel).
    # TODO(synk): the nn.Embedding gather stays in plain JAX; a Pallas DMA
    # gather is not worthwhile at this size.
    x = jnp.take(emb_table, fingerprints, axis=0)                   # (N, DIM)

    # One-time parameter packing/padding/casting, then a jitted per-batch call.
    gnn_forward = build_gnn_forward(Wfp, bfp, Wout, bout, Wprop, bprop)

    out = gnn_forward(x, A, M, pool)
    out = jax.block_until_ready(out)

    ref = gnn_reference(x, A, M, pool, Wfp, bfp, Wout, bout, Wprop, bprop)
    # Tolerance loosened (5e-2) because MXU operands (and, on v6e/v7x, the
    # hidden-layer activations) are bf16 with f32 accumulation; the reference
    # stays full f32.
    np.testing.assert_allclose(np.asarray(out), np.asarray(ref), rtol=5e-2, atol=5e-2)

    print("KERNEL_OK")
</pallas_src>

<mosaic_0001>
module attributes {stable_mosaic.version = 11 : i64} {
  func.func @gnn_kernel(%arg0: memref<32x128xf32, #tpu.memory_space<vmem>>, %arg1: memref<32x32xbf16, #tpu.memory_space<vmem>>, %arg2: memref<8x32xbf16, #tpu.memory_space<vmem>>, %arg3: memref<4x128x128xbf16, #tpu.memory_space<vmem>>, %arg4: memref<4x1x128xf32, #tpu.memory_space<vmem>>, %arg5: memref<1x128xbf16, #tpu.memory_space<vmem>>, %arg6: memref<1xf32, #tpu.memory_space<smem>>, %arg7: memref<8x128xf32, #tpu.memory_space<vmem>>) attributes {dimension_semantics = [], scalar_prefetch = 0 : i64, scratch_operands = 0 : i64, tpu.core_type = #tpu.core_type<tc>} {
    %c0 = arith.constant 0 : index
    %c0_0 = arith.constant 0 : index
    %0 = vector.load %arg0[%c0, %c0_0] : memref<32x128xf32, #tpu.memory_space<vmem>>, vector<32x128xf32>
    %c0_1 = arith.constant 0 : index
    %c0_2 = arith.constant 0 : index
    %1 = vector.load %arg1[%c0_1, %c0_2] : memref<32x32xbf16, #tpu.memory_space<vmem>>, vector<32x32xbf16>
    %c0_3 = arith.constant 0 : index
    %c0_4 = arith.constant 0 : index
    %c0_5 = arith.constant 0 : index
    %2 = vector.load %arg3[%c0_3, %c0_4, %c0_5] : memref<4x128x128xbf16, #tpu.memory_space<vmem>>, vector<1x128x128xbf16>
    %3 = vector.shape_cast %2 : vector<1x128x128xbf16> to vector<128x128xbf16>
    %c0_6 = arith.constant 0 : index
    %c0_7 = arith.constant 0 : index
    %c0_8 = arith.constant 0 : index
    %4 = vector.load %arg4[%c0_6, %c0_7, %c0_8] : memref<4x1x128xf32, #tpu.memory_space<vmem>>, vector<1x1x128xf32>
    %5 = vector.shape_cast %4 : vector<1x1x128xf32> to vector<1x128xf32>
    %6 = arith.truncf %0 : vector<32x128xf32> to vector<32x128xbf16>
    %cst = arith.constant dense<0.000000e+00> : vector<32x128xf32>
    %7 = tpu.matmul %6, %3, %cst {dimension_numbers = #tpu.dot_dimension_numbers<[1], [0], [0], [1], [0, 0, 1, 1], [], []>} : vector<32x128xbf16>, vector<128x128xbf16>, vector<32x128xf32> -> vector<32x128xf32>
    %8 = vector.broadcast %5 : vector<1x128xf32> to vector<32x128xf32>
    %9 = arith.addf %7, %8 : vector<32x128xf32>
    %cst_9 = arith.constant 0.000000e+00 : f32
    %10 = vector.broadcast %cst_9 : f32 to vector<32x128xf32>
    %11 = arith.maximumf %9, %10 : vector<32x128xf32>
    %12 = arith.truncf %11 : vector<32x128xf32> to vector<32x128xbf16>
    %cst_10 = arith.constant dense<0.000000e+00> : vector<32x128xf32>
    %13 = tpu.matmul %1, %12, %cst_10 {dimension_numbers = #tpu.dot_dimension_numbers<[1], [0], [0], [1], [0, 0, 1, 1], [], []>} : vector<32x32xbf16>, vector<32x128xbf16>, vector<32x128xf32> -> vector<32x128xf32>
    %14 = arith.addf %0, %13 : vector<32x128xf32>
    %c1 = arith.constant 1 : index
    %c0_11 = arith.constant 0 : index
    %c0_12 = arith.constant 0 : index
    %15 = vector.load %arg3[%c1, %c0_11, %c0_12] : memref<4x128x128xbf16, #tpu.memory_space<vmem>>, vector<1x128x128xbf16>
    %16 = vector.shape_cast %15 : vector<1x128x128xbf16> to vector<128x128xbf16>
    %c1_13 = arith.constant 1 : index
    %c0_14 = arith.constant 0 : index
    %c0_15 = arith.constant 0 : index
    %17 = vector.load %arg4[%c1_13, %c0_14, %c0_15] : memref<4x1x128xf32, #tpu.memory_space<vmem>>, vector<1x1x128xf32>
    %18 = vector.shape_cast %17 : vector<1x1x128xf32> to vector<1x128xf32>
    %19 = arith.truncf %14 : vector<32x128xf32> to vector<32x128xbf16>
    %cst_16 = arith.constant dense<0.000000e+00> : vector<32x128xf32>
    %20 = tpu.matmul %19, %16, %cst_16 {dimension_numbers = #tpu.dot_dimension_numbers<[1], [0], [0], [1], [0, 0, 1, 1], [], []>} : vector<32x128xbf16>, vector<128x128xbf16>, vector<32x128xf32> -> vector<32x128xf32>
    %21 = vector.broadcast %18 : vector<1x128xf32> to vector<32x128xf32>
    %22 = arith.addf %20, %21 : vector<32x128xf32>
    %cst_17 = arith.constant 0.000000e+00 : f32
    %23 = vector.broadcast %cst_17 : f32 to vector<32x128xf32>
    %24 = arith.maximumf %22, %23 : vector<32x128xf32>
    %25 = arith.truncf %24 : vector<32x128xf32> to vector<32x128xbf16>
    %cst_18 = arith.constant dense<0.000000e+00> : vector<32x128xf32>
    %26 = tpu.matmul %1, %25, %cst_18 {dimension_numbers = #tpu.dot_dimension_numbers<[1], [0], [0], [1], [0, 0, 1, 1], [], []>} : vector<32x32xbf16>, vector<32x128xbf16>, vector<32x128xf32> -> vector<32x128xf32>
    %27 = arith.addf %14, %26 : vector<32x128xf32>
    %c0_19 = arith.constant 0 : index
    %c0_20 = arith.constant 0 : index
    %28 = vector.load %arg2[%c0_19, %c0_20] : memref<8x32xbf16, #tpu.memory_space<vmem>>, vector<8x32xbf16>
    %29 = arith.truncf %27 : vector<32x128xf32> to vector<32x128xbf16>
    %cst_21 = arith.constant dense<0.000000e+00> : vector<8x128xf32>
    %30 = tpu.matmul %28, %29, %cst_21 {dimension_numbers = #tpu.dot_dimension_numbers<[1], [0], [0], [1], [0, 0, 1, 1], [], []>} : vector<8x32xbf16>, vector<32x128xbf16>, vector<8x128xf32> -> vector<8x128xf32>
    %c2 = arith.constant 2 : index
    %c0_22 = arith.constant 0 : index
    %c0_23 = arith.constant 0 : index
    %31 = vector.load %arg3[%c2, %c0_22, %c0_23] : memref<4x128x128xbf16, #tpu.memory_space<vmem>>, vector<1x128x128xbf16>
    %32 = vector.shape_cast %31 : vector<1x128x128xbf16> to vector<128x128xbf16>
    %c2_24 = arith.constant 2 : index
    %c0_25 = arith.constant 0 : index
    %c0_26 = arith.constant 0 : index
    %33 = vector.load %arg4[%c2_24, %c0_25, %c0_26] : memref<4x1x128xf32, #tpu.memory_space<vmem>>, vector<1x1x128xf32>
    %34 = vector.shape_cast %33 : vector<1x1x128xf32> to vector<1x128xf32>
    %35 = arith.truncf %30 : vector<8x128xf32> to vector<8x128xbf16>
    %cst_27 = arith.constant dense<0.000000e+00> : vector<8x128xf32>
    %36 = tpu.matmul %35, %32, %cst_27 {dimension_numbers = #tpu.dot_dimension_numbers<[1], [0], [0], [1], [0, 0, 1, 1], [], []>} : vector<8x128xbf16>, vector<128x128xbf16>, vector<8x128xf32> -> vector<8x128xf32>
    %37 = vector.broadcast %34 : vector<1x128xf32> to vector<8x128xf32>
    %38 = arith.addf %36, %37 : vector<8x128xf32>
    %cst_28 = arith.constant 0.000000e+00 : f32
    %39 = vector.broadcast %cst_28 : f32 to vector<8x128xf32>
    %40 = arith.maximumf %38, %39 : vector<8x128xf32>
    %c3 = arith.constant 3 : index
    %c0_29 = arith.constant 0 : index
    %c0_30 = arith.constant 0 : index
    %41 = vector.load %arg3[%c3, %c0_29, %c0_30] : memref<4x128x128xbf16, #tpu.memory_space<vmem>>, vector<1x128x128xbf16>
    %42 = vector.shape_cast %41 : vector<1x128x128xbf16> to vector<128x128xbf16>
    %c3_31 = arith.constant 3 : index
    %c0_32 = arith.constant 0 : index
    %c0_33 = arith.constant 0 : index
    %43 = vector.load %arg4[%c3_31, %c0_32, %c0_33] : memref<4x1x128xf32, #tpu.memory_space<vmem>>, vector<1x1x128xf32>
    %44 = vector.shape_cast %43 : vector<1x1x128xf32> to vector<1x128xf32>
    %45 = arith.truncf %40 : vector<8x128xf32> to vector<8x128xbf16>
    %cst_34 = arith.constant dense<0.000000e+00> : vector<8x128xf32>
    %46 = tpu.matmul %45, %42, %cst_34 {dimension_numbers = #tpu.dot_dimension_numbers<[1], [0], [0], [1], [0, 0, 1, 1], [], []>} : vector<8x128xbf16>, vector<128x128xbf16>, vector<8x128xf32> -> vector<8x128xf32>
    %47 = vector.broadcast %44 : vector<1x128xf32> to vector<8x128xf32>
    %48 = arith.addf %46, %47 : vector<8x128xf32>
    %cst_35 = arith.constant 0.000000e+00 : f32
    %49 = vector.broadcast %cst_35 : f32 to vector<8x128xf32>
    %50 = arith.maximumf %48, %49 : vector<8x128xf32>
    %c0_36 = arith.constant 0 : index
    %c0_37 = arith.constant 0 : index
    %51 = vector.load %arg5[%c0_36, %c0_37] : memref<1x128xbf16, #tpu.memory_space<vmem>>, vector<1x128xbf16>
    %52 = arith.extf %51 : vector<1x128xbf16> to vector<1x128xf32>
    %53 = vector.broadcast %52 : vector<1x128xf32> to vector<8x128xf32>
    %54 = arith.mulf %50, %53 : vector<8x128xf32>
    %cst_38 = arith.constant dense<0.000000e+00> : vector<8xf32>
    %55 = vector.multi_reduction <add>, %54, %cst_38 [1] : vector<8x128xf32> to vector<8xf32>
    %56 = vector.shape_cast %55 : vector<8xf32> to vector<8x1xf32>
    %c0_39 = arith.constant 0 : index
    %57 = memref.load %arg6[%c0_39] : memref<1xf32, #tpu.memory_space<smem>>
    %58 = vector.broadcast %57 : f32 to vector<8x1xf32>
    %59 = arith.addf %56, %58 : vector<8x1xf32>
    %60 = vector.shape_cast %59 : vector<8x1xf32> to vector<8x1xf32>
    %61 = vector.broadcast %60 : vector<8x1xf32> to vector<8x128xf32>
    %c0_40 = arith.constant 0 : index
    %c0_41 = arith.constant 0 : index
    %62 = vector.load %arg7[%c0_40, %c0_41] : memref<8x128xf32, #tpu.memory_space<vmem>>, vector<8x128xf32>
    tpu.vector_store %arg7[%c0_40, %c0_41], %61 {strides = array<i32>} : memref<8x128xf32, #tpu.memory_space<vmem>>, vector<8x128xf32>,
    return
  }
}

</mosaic_0001>

<bundles_post_ra>
// kernel: forward.1
= control target key start
LH: loop header
LB: loop body
LE: loop exit
PB: predicated region body
PF: predicated region fallthrough
CT: control target
= control target key end

     0   :  { %13 = vsyncpa [#allocation4], 0  ;;  %s985_s24 = smov [#allocation3]   ;;  %s1112_s0 = inlined_call_operand.vmem [shape: f32[32,128], index: 0, kind: input, shape index: {}]   ;;  %s1113_s1 = inlined_call_operand.vmem [shape: bf16[32,32], index: 1, kind: input, shape index: {}]   ;;  %s1114_s2 = inlined_call_operand.vmem [shape: bf16[8,32], index: 2, kind: input, shape index: {}]   ;;  %s1115_s3 = inlined_call_operand.hbm [shape: bf16[4,128,128], index: 3, kind: input, shape index: {}]   ;;  %s1116_s4 = inlined_call_operand.vmem [shape: f32[4,1,128], index: 4, kind: input, shape index: {}]   ;;  %s1117_s5 = inlined_call_operand.vmem [shape: bf16[1,128], index: 5, kind: input, shape index: {}]   ;;  %s1118_s6 = inlined_call_operand.<no memory space> [shape: f32[1], index: 6, kind: input, shape index: {}]   ;;  %s1119_s7 = inlined_call_operand.vmem [shape: f32[8,128], index: 7, kind: output, shape index: {}]  }
   0x1   :  { %s25_s25 = sshll.u32 %s985_s24, 4  ;;  %s26_s25 = int_to_ptr.vmem [resolvable:$true] %s25_s25 }
   0x2   :  { %s971_s26 = scalar_lea.vmem %s26_s25, 4096  ;;  %p976_p1 = scmp.lt.s32.totalorder %s26_s25, %s26_s25 }
   0x3   :  { %p972_p0 = scmp.ne.s32.totalorder %s26_s25, %s971_s26  ;;  %p977_p2 = scmp.lt.s32.totalorder %s971_s26, %s971_s26 }
   0x5   :  { %p978_p3 = por %p977_p2, %p976_p1 }
   0x7   :  { %p979_p4 = pnand %p978_p3, %p972_p0 }
   0x9   :  { %982 = shalt.err (!%p979_p4)
}
   0xa   :  { %s986_s27 = smov 64   ;;  %s987_s28 = smov 4  }
   0xb   :  { %31 = dma.hbm_to_vmem [thread:$0]  %s1115_s3, 4096, %s26_s25, [#allocation4], %s986_s27, %s986_s27, %s987_s28  }
   0xc   :  { %983 = dma.done.wait [#allocation4], 4096  }
   0xd   :  { %984 = vsyncadd [#allocation4], 4294963200  ;;  %v929_v0 = vld [vmem:[#allocation3 + $0x38] sm:$0xff]   ;;  %v930_v1 = vld [vmem:[#allocation3 + $0x30] sm:$0xff]   ;;  %vm188_vm0 = vcmask 261120   ;;  %vm989_vm1 = vmmov 0  }
   0xe   :  { %820 = vmatprep.subr.bf16.mxu0 %v929_v0  ;;  %v931_v2 = vld [vmem:[#allocation3 + $0x28] sm:$0xff]   ;;  %v932_v3 = vld [vmem:[#allocation3 + $0x20] sm:$0xff]   ;;  %v933_v7 = vld [vmem:[#allocation3 + $0x18] sm:$0xff]  }
   0xf   :  { %821 = vmatpush3.bf16.msra.mxu0 %v929_v0  ;;  %v1036_v4 = vld [vmem:[%s1112_s0] sm:$0xff]  ;;  %v1041_v5 = vld [vmem:[%s1112_s0 + $0x8] sm:$0xff]  ;;  %v934_v8 = vld [vmem:[#allocation3 + $0x10] sm:$0xff]   ;;  %v988_v0 = vmov 0.0  }
  0x10   :  { %822 = vmatprep.subr.bf16.mxu0 %v930_v1  ;;  %v67_v6 = vpack.c.bf16 %v1041_v5, %v1036_v4  ;;  %v935_v9 = vld [vmem:[#allocation3 + $0x8] sm:$0xff]   ;;  %v936_v10 = vld [vmem:[#allocation3] sm:$0xff]   ;;  %v44_v11 = vld [vmem:[%s1112_s0 + $0x10] sm:$0xff] }
  0x11   :  { %v45_v12 = vld [vmem:[%s1112_s0 + $0x18] sm:$0xff]  ;;  %v937_v14 = vld [vmem:[%s1113_s1] sm:$0xff]   ;;  %v938_v31 = vld [vmem:[%s1113_s1 + $0x8] sm:$0xff]  }
  0x12   :  { %836 = vmatprep.mubr.bf16.mxu0 %v67_v6  ;;  %v68_v13 = vpack.c.bf16 %v45_v12, %v44_v11  ;;  %844 = vmatprep.mubr.msk.bf16.mxu1 %vm188_vm0, %v937_v14  ;;  %v725_v16 = vld [vmem:[%s1116_s4] ss:$0 sm:$0xff]  ;;  %v939_v30 = vld [vmem:[#allocation3 + $0x78] sm:$0xff]   ;;  %v940_v32 = vld [vmem:[#allocation3 + $0x70] sm:$0xff]  }
  0x13   :  { %823 = vmatpush3.bf16.msra.mxu0 %v930_v1  ;;  %v941_v33 = vld [vmem:[#allocation3 + $0x68] sm:$0xff]   ;;  %v942_v34 = vld [vmem:[#allocation3 + $0x60] sm:$0xff]   ;;  %v943_v35 = vld [vmem:[#allocation3 + $0x58] sm:$0xff]  }
  0x14   :  { %824 = vmatprep.subr.bf16.mxu0 %v931_v2  ;;  %v944_v36 = vld [vmem:[#allocation3 + $0x50] sm:$0xff]   ;;  %v945_v37 = vld [vmem:[#allocation3 + $0x48] sm:$0xff]   ;;  %v946_v38 = vld [vmem:[#allocation3 + $0x40] sm:$0xff]  }
  0x15   :  { %v739_v50 = vld [vmem:[%s1116_s4 + $0x1] ss:$0 sm:$0xff]  ;;  %v947_v1 = vld [vmem:[#allocation3 + $0xb8] sm:$0xff]   ;;  %v952_v6 = vld [vmem:[#allocation3 + $0x90] sm:$0xff]  }
  0x17   :  { %825 = vmatpush3.bf16.msra.mxu0 %v931_v2  ;;  %v948_v2 = vld [vmem:[#allocation3 + $0xb0] sm:$0xff]  }
  0x18   :  { %826 = vmatprep.subr.bf16.mxu0 %v932_v3 }
  0x1b   :  { %827 = vmatpush3.bf16.msra.mxu0 %v932_v3  ;;  %v949_v3 = vld [vmem:[#allocation3 + $0xa8] sm:$0xff]  }
  0x1c   :  { %828 = vmatprep.subr.bf16.mxu0 %v933_v7 }
  0x1f   :  { %829 = vmatpush3.bf16.msra.mxu0 %v933_v7  ;;  %v953_v7 = vld [vmem:[#allocation3 + $0x88] sm:$0xff]  }
  0x20   :  { %830 = vmatprep.subr.bf16.mxu0 %v934_v8 }
  0x23   :  { %831 = vmatpush3.bf16.msra.mxu0 %v934_v8 }
  0x24   :  { %832 = vmatprep.subr.bf16.mxu0 %v935_v9 }
  0x27   :  { %833 = vmatpush3.bf16.msra.mxu0 %v935_v9 }
  0x28   :  { %834 = vmatprep.subr.bf16.mxu0 %v936_v10 }
  0x2b   :  { %835 = vmatpush3.bf16.msra.mxu0 %v936_v10 }
  0x2e   :  { %837 = vmatmul.mubr.bf16.vlgmr.msra.gmra.mxu0 %v68_v13 }
  0x2f   :  { %872 = vmatprep.mubr.msk.bf16.mxu0 %vm188_vm0, %v937_v14 }
  0xee   :  { %v838_v15 = vpop.f32.mrf.mxu0 }
  0xef   :  { %v166_v18 = vadd.f32 %v838_v15, %v725_v16 }
  0xf0   :  { %v157_v17 = vpop.f32.mrf.mxu0 }
  0xf1   :  { %v158_v20 = vadd.f32 %v725_v16, %v157_v17  ;;  %v174_v23 = vmax.f32 %v166_v18, 0.0  ;;  %v431_v18 = vld [vmem:[%s1114_s2] sm:$0xf] }
  0xf2   :  { %v839_v19 = vpop.f32.mrf.mxu0 }
  0xf3   :  { %v169_v21 = vadd.f32 %v839_v19, %v725_v16  ;;  %v172_v26 = vmax.f32 %v158_v20, 0.0  ;;  %v954_v19 = vld [vmem:[#allocation3 + $0x80] sm:$0xff]   ;;  %v955_v20 = vld [vmem:[#allocation3 + $0xf8] sm:$0xff]  }
  0xf4   :  { %v160_v22 = vpop.f32.mrf.mxu0 }
  0xf5   :  { %v175_v24 = vmax.f32 %v169_v21, 0.0  ;;  %v161_v25 = vadd.f32 %v725_v16, %v160_v22  ;;  %v956_v21 = vld [vmem:[#allocation3 + $0xf0] sm:$0xff]   ;;  %v957_v22 = vld [vmem:[#allocation3 + $0xe8] sm:$0xff]  }
  0xf7   :  { %v173_v27 = vmax.f32 %v161_v25, 0.0  ;;  %v177_v28 = vpack.c.bf16 %v175_v24, %v174_v23  ;;  %v958_v23 = vld [vmem:[#allocation3 + $0xe0] sm:$0xff]   ;;  %v959_v24 = vld [vmem:[#allocation3 + $0xd8] sm:$0xff]   ;;  %v960_v25 = vld [vmem:[#allocation3 + $0xd0] sm:$0xff]  }
  0xf9   :  { %v176_v29 = vpack.c.bf16 %v173_v27, %v172_v26  ;;  %840 = vmatprep.subr.bf16.mxu1 %v177_v28 }
  0xfa   :  { %841 = vmatpush3.bf16.msra.mxu1 %v177_v28 }
  0xfb   :  { %842 = vmatprep.subr.bf16.mxu1 %v176_v29 }
  0xfe   :  { %843 = vmatpush3.bf16.msra.mxu1 %v176_v29 }
  0xff   :  { %848 = vmatprep.subr.bf16.mxu1 %v939_v30 }
 0x101   :  { %845 = vmatmul.mubr.msk.bf16.vlgmr.msra.gmra.mxu1 %vm188_vm0, %v938_v31 }
 0x102   :  { %849 = vmatpush3.bf16.msra.mxu1 %v939_v30 }
 0x103   :  { %850 = vmatprep.subr.bf16.mxu1 %v940_v32 }
 0x106   :  { %851 = vmatpush3.bf16.msra.mxu1 %v940_v32  ;;  %v962_v32 = vld [vmem:[#allocation3 + $0xc0] sm:$0xff]  }
 0x107   :  { %852 = vmatprep.subr.bf16.mxu1 %v941_v33 }
 0x10a   :  { %853 = vmatpush3.bf16.msra.mxu1 %v941_v33  ;;  %v752_v33 = vld [vmem:[%s1116_s4 + $0x2] ss:$0 sm:$0xff] }
 0x10b   :  { %854 = vmatprep.subr.bf16.mxu1 %v942_v34 }
 0x10e   :  { %855 = vmatpush3.bf16.msra.mxu1 %v942_v34 }
 0x10f   :  { %856 = vmatprep.subr.bf16.mxu1 %v943_v35 }
 0x112   :  { %857 = vmatpush3.bf16.msra.mxu1 %v943_v35 }
 0x113   :  { %858 = vmatprep.subr.bf16.mxu1 %v944_v36 }
 0x116   :  { %859 = vmatpush3.bf16.msra.mxu1 %v944_v36 }
 0x117   :  { %860 = vmatprep.subr.bf16.mxu1 %v945_v37 }
 0x11a   :  { %861 = vmatpush3.bf16.msra.mxu1 %v945_v37 }
 0x11b   :  { %862 = vmatprep.subr.bf16.mxu1 %v946_v38 }
 0x11e   :  { %863 = vmatpush3.bf16.msra.mxu1 %v946_v38 }
 0x11f   :  { %884 = vmatprep.subr.bf16.mxu1 %v988_v0 }
 0x1c1   :  { %v846_v39 = vpop.f32.mrf.mxu1 }
 0x1c2   :  { %v246_v46 = vadd.f32 %v846_v39, %v44_v11 }
 0x1c3   :  { %v229_v40 = vpop.f32.mrf.mxu1 }
 0x1c4   :  { %v244_v44 = vadd.f32 %v229_v40, %v1036_v4  ;;  %v950_v4 = vld [vmem:[#allocation3 + $0xa0] sm:$0xff]  }
 0x1c5   :  { %v847_v41 = vpop.f32.mrf.mxu1 }
 0x1c6   :  { %v247_v42 = vadd.f32 %v847_v41, %v45_v12  ;;  %v709_v41 = vlaneseq }
 0x1c7   :  { %v232_v43 = vpop.f32.mrf.mxu1 }
 0x1c8   :  { %v245_v45 = vadd.f32 %v232_v43, %v1041_v5  ;;  %v268_v48 = vpack.c.bf16 %v247_v42, %v246_v46  ;;  %v951_v5 = vld [vmem:[#allocation3 + $0x98] sm:$0xff]   ;;  %v707_v43 = vld [vmem:[%s1117_s5] sm:$0x1] }
 0x1ca   :  { %v267_v47 = vpack.c.bf16 %v245_v45, %v244_v44 }
 0x1cc   :  { %864 = vmatprep.mubr.bf16.mxu1 %v267_v47 }
 0x1cd   :  { %865 = vmatmul.mubr.bf16.vlgmr.msra.gmra.mxu1 %v268_v48 }
 0x1ce   :  { %900 = vmatprep.mubr.msk.bf16.mxu1 %vm989_vm1, %v988_v0  ;;  %885 = vmatpush3.bf16.msra.mxu1 %v947_v1 }
 0x1cf   :  { %886 = vmatprep.subr.bf16.mxu1 %v988_v0 }
 0x1d2   :  { %887 = vmatpush3.bf16.msra.mxu1 %v948_v2 }
 0x1d3   :  { %888 = vmatprep.subr.bf16.mxu1 %v988_v0 }
 0x1d6   :  { %889 = vmatpush3.bf16.msra.mxu1 %v949_v3 }
 0x1d7   :  { %890 = vmatprep.subr.bf16.mxu1 %v988_v0 }
 0x1da   :  { %891 = vmatpush3.bf16.msra.mxu1 %v950_v4 }
 0x1db   :  { %892 = vmatprep.subr.bf16.mxu1 %v988_v0 }
 0x1de   :  { %893 = vmatpush3.bf16.msra.mxu1 %v951_v5 }
 0x1df   :  { %894 = vmatprep.subr.bf16.mxu1 %v988_v0 }
 0x1e2   :  { %895 = vmatpush3.bf16.msra.mxu1 %v952_v6 }
 0x1e3   :  { %896 = vmatprep.subr.bf16.mxu1 %v988_v0 }
 0x1e6   :  { %897 = vmatpush3.bf16.msra.mxu1 %v953_v7 }
 0x1e7   :  { %898 = vmatprep.subr.bf16.mxu1 %v988_v0 }
 0x1ea   :  { %899 = vmatpush3.bf16.msra.mxu1 %v954_v19 }
 0x28d   :  { %v866_v49 = vpop.f32.mrf.mxu1 }
 0x28e   :  { %v366_v52 = vadd.f32 %v866_v49, %v739_v50 }
 0x28f   :  { %v357_v51 = vpop.f32.mrf.mxu1 }
 0x290   :  { %v358_v54 = vadd.f32 %v739_v50, %v357_v51  ;;  %v374_v57 = vmax.f32 %v366_v52, 0.0 }
 0x291   :  { %v867_v53 = vpop.f32.mrf.mxu1 }
 0x292   :  { %v369_v55 = vadd.f32 %v867_v53, %v739_v50  ;;  %v372_v60 = vmax.f32 %v358_v54, 0.0 }
 0x293   :  { %v360_v56 = vpop.f32.mrf.mxu1 }
 0x294   :  { %v375_v58 = vmax.f32 %v369_v55, 0.0  ;;  %v361_v59 = vadd.f32 %v739_v50, %v360_v56  ;;  %v717_v55 = vstv %s1118_s6 }
 0x296   :  { %v377_v61 = vpack.c.bf16 %v375_v58, %v374_v57  ;;  %v373_v62 = vmax.f32 %v361_v59, 0.0 }
 0x298   :  { %v376_v63 = vpack.c.bf16 %v373_v62, %v372_v60  ;;  %868 = vmatprep.subr.bf16.mxu0 %v377_v61 }
 0x299   :  { %869 = vmatpush3.bf16.msra.mxu0 %v377_v61 }
 0x29a   :  { %870 = vmatprep.subr.bf16.mxu0 %v376_v63 }
 0x29d   :  { %871 = vmatpush3.bf16.msra.mxu0 %v376_v63 }
 0x29e   :  { %876 = vmatprep.subr.bf16.mxu0 %v988_v0 }
 0x2a0   :  { %873 = vmatmul.mubr.msk.bf16.vlgmr.msra.gmra.mxu0 %vm188_vm0, %v938_v31  ;;  %v961_v31 = vld [vmem:[#allocation3 + $0xc8] sm:$0xff]  }
 0x2a1   :  { %880 = vmatprep.mubr.msk.bf16.mxu0 %vm989_vm1, %v988_v0 }
 0x360   :  { %v874_v8 = vpop.f32.mrf.mxu0 }
 0x361   :  { %v429_v11 = vadd.f32 %v874_v8, %v246_v46  ;;  %v762_v46 = vld [vmem:[%s1116_s4 + $0x3] ss:$0 sm:$0xff] }
 0x362   :  { %v412_v9 = vpop.f32.mrf.mxu0 }
 0x363   :  { %v427_v16 = vadd.f32 %v412_v9, %v244_v44  ;;  %v708_v44 = vunpack.c.l.bf16 %v707_v43 }
 0x364   :  { %v875_v10 = vpop.f32.mrf.mxu0 }
 0x365   :  { %v430_v12 = vadd.f32 %v875_v10, %v247_v42  ;;  %v710_v42 = vshrl.u32 %v709_v41, 7 }
 0x366   :  { %v415_v13 = vpop.f32.mrf.mxu0 }
 0x367   :  { %v433_v14 = vpack.c.bf16 %v430_v12, %v429_v11  ;;  %v428_v15 = vadd.f32 %v415_v13, %v245_v45  ;;  %v711_v45 = vsub.s32 0, %v710_v42 }
 0x369   :  { %877 = vmatpush3.bf16.msra.mxu0 %v433_v14  ;;  %v432_v17 = vpack.c.bf16 %v428_v15, %v427_v16  ;;  %v712_v49 = vrot.slane %v708_v44, %v711_v45 }
 0x36a   :  { %878 = vmatprep.subr.bf16.mxu0 %v988_v0 }
 0x36d   :  { %879 = vmatpush3.bf16.msra.mxu0 %v432_v17 }
 0x36e   :  { %904 = vmatprep.subr.bf16.mxu0 %v988_v0 }
 0x370   :  { %881 = vmatmul.mubr.msk.bf16.vlgmr.msra.gmra.mxu0 %vm188_vm0, %v431_v18 }
 0x371   :  { %920 = vmatprep.mubr.msk.bf16.mxu0 %vm989_vm1, %v988_v0  ;;  %905 = vmatpush3.bf16.msra.mxu0 %v955_v20 }
 0x372   :  { %906 = vmatprep.subr.bf16.mxu0 %v988_v0 }
 0x375   :  { %907 = vmatpush3.bf16.msra.mxu0 %v956_v21 }
 0x376   :  { %908 = vmatprep.subr.bf16.mxu0 %v988_v0 }
 0x379   :  { %909 = vmatpush3.bf16.msra.mxu0 %v957_v22 }
 0x37a   :  { %910 = vmatprep.subr.bf16.mxu0 %v988_v0 }
 0x37d   :  { %911 = vmatpush3.bf16.msra.mxu0 %v958_v23 }
 0x37e   :  { %912 = vmatprep.subr.bf16.mxu0 %v988_v0 }
 0x381   :  { %913 = vmatpush3.bf16.msra.mxu0 %v959_v24 }
 0x382   :  { %914 = vmatprep.subr.bf16.mxu0 %v988_v0 }
 0x385   :  { %915 = vmatpush3.bf16.msra.mxu0 %v960_v25 }
 0x386   :  { %916 = vmatprep.subr.bf16.mxu0 %v988_v0 }
 0x389   :  { %917 = vmatpush3.bf16.msra.mxu0 %v961_v31 }
 0x38a   :  { %918 = vmatprep.subr.bf16.mxu0 %v988_v0 }
 0x38d   :  { %919 = vmatpush3.bf16.msra.mxu0 %v962_v32 }
 0x430   :  { %v471_v26 = vpop.f32.mrf.mxu0 }
 0x431   :  { %v496_v27 = vpack.c.bf16 %v471_v26, %v471_v26 }
 0x432   :  { %v882_v28 = vpop.f32.mrf.mxu0 }
 0x433   :  { %901 = vmatmul.mubr.bf16.vlgmr.msra.gmra.mxu1 %v496_v27 }
 0x434   :  { %v474_v29 = vpop.f32.mrf.mxu0 }
 0x436   :  { %v883_v30 = vpop.f32.mrf.mxu0 }
 0x4f3   :  { %v585_v34 = vpop.f32.mrf.mxu1 }
 0x4f4   :  { %v586_v35 = vadd.f32 %v752_v33, %v585_v34 }
 0x4f5   :  { %v902_v36 = vpop.f32.mrf.mxu1 }
 0x4f6   :  { %v591_v37 = vmax.f32 %v586_v35, 0.0 }
 0x4f7   :  { %v588_v38 = vpop.f32.mrf.mxu1 }
 0x4f8   :  { %v611_v39 = vpack.c.bf16 %v591_v37, %v591_v37 }
 0x4f9   :  { %v903_v40 = vpop.f32.mrf.mxu1 }
 0x4fa   :  { %921 = vmatmul.mubr.bf16.vlgmr.msra.gmra.mxu0 %v611_v39 }
 0x5ba   :  { %v700_v47 = vpop.f32.mrf.mxu0 }
 0x5bb   :  { %v701_v48 = vadd.f32 %v762_v46, %v700_v47 }
 0x5bc   :  { %v922_v50 = vpop.f32.mrf.mxu0 }
 0x5bd   :  { %v706_v51 = vmax.f32 %v701_v48, 0.0 }
 0x5be   :  { %v703_v52 = vpop.f32.mrf.mxu0 }
 0x5bf   :  { %v713_v53 = vmul.f32 %v712_v49, %v706_v51 }
 0x5c0   :  { %v923_v54 = vpop.f32.mrf.mxu0 }
 0x5c1   :  { %714 = vadd.xlane.f32.xlu0 %v713_v53 }
 0x64a   :  { %v715_v56 = vpop.xlane.xlu0 %714 }
 0x64b   :  { %v718_v57 = vadd.f32 %v717_v55, %v715_v56 }
 0x64d   :  { %719 = vst [vmem:[%s1119_s7] sm:$0xff] %v718_v57 }
 0x64e   :  { %724 = vsyncpa [#allocation4], 1 }

</bundles_post_ra>
